<compile_context>
chip_gen: v6e
topology: v6e:2x2x1
jax: 0.10.0
libtpu: 0.0.40
codegen_flags: <defaults>
</compile_context>

<pallas_src>
import jax
import jax.numpy as jnp
from jax.experimental import pallas as pl
from jax.experimental.pallas import tpu as pltpu


def _dma_copy_kernel(x_hbm, o_hbm, sem):
    # One full-array HBM->HBM async copy; no round-trip through vregs/VMEM.
    cp = pltpu.make_async_copy(x_hbm, o_hbm, sem)
    cp.start()
    cp.wait()


def _materialized_copy(x: jax.Array) -> jax.Array:
    """HBM->HBM copy of x via a single direct DMA (no VMEM staging)."""
    orig_shape = x.shape
    xk = x.reshape((1,)) if x.ndim == 0 else x  # keep DMA operand at least 1-D

    out = pl.pallas_call(
        _dma_copy_kernel,
        out_shape=jax.ShapeDtypeStruct(xk.shape, xk.dtype),
        in_specs=[pl.BlockSpec(memory_space=pl.ANY)],
        out_specs=pl.BlockSpec(memory_space=pl.ANY),
        scratch_shapes=[pltpu.SemaphoreType.DMA],
    )(xk)
    return out.reshape(orig_shape)


def dummy_body_forward(x: jax.Array, *, materialize: bool = False) -> jax.Array:
    """Forward pass of DummyBody: returns x unchanged (feature_dim == state_dim).

    Default path is the true identity (no kernel, 0 bytes moved). Set
    materialize=True if a fresh output buffer from a kernel boundary is
    required; that path is a single HBM->HBM DMA at the memory roofline.
    """
    if not materialize:
        return x
    return _materialized_copy(x)


if __name__ == "__main__":
    # DummyBody(state_dim) has no parameters; feature_dim = state_dim.
    batch, state_dim = 2, 32
    key = jax.random.PRNGKey(0)
    x = jax.random.normal(key, (batch, state_dim), dtype=jnp.float32)

    # Fast path: the identity forward (no data movement at all).
    y_fast = dummy_body_forward(x)
    jax.block_until_ready(y_fast)
    assert y_fast.shape == x.shape and y_fast.dtype == x.dtype
    assert bool(jnp.all(y_fast == x))

    # Kernel path: materialized copy through the direct HBM->HBM DMA.
    y_copy = dummy_body_forward(x, materialize=True)
    jax.block_until_ready(y_copy)
    assert y_copy.shape == x.shape and y_copy.dtype == x.dtype
    assert bool(jnp.all(y_copy == x))

    # Packed dtype + 3-D shape: DMA path is dtype/shape agnostic (no sublane
    # alignment or lane-density concerns).
    xb = jax.random.normal(jax.random.PRNGKey(1), (2, 8, 32)).astype(jnp.bfloat16)
    yb = dummy_body_forward(xb, materialize=True)
    jax.block_until_ready(yb)
    assert yb.shape == xb.shape and yb.dtype == xb.dtype
    assert bool(jnp.all(yb == xb))

    # Awkward shape (no 128-multiple factor, odd dims) that would have stressed
    # the old VMEM-tiled path; the DMA path handles it without any guards.
    xo = jnp.arange(3 * 5 * 7, dtype=jnp.int32).reshape(3, 5, 7)
    yo = dummy_body_forward(xo, materialize=True)
    jax.block_until_ready(yo)
    assert yo.shape == xo.shape and yo.dtype == xo.dtype
    assert bool(jnp.all(yo == xo))

    print("KERNEL_OK")
</pallas_src>

<mosaic_0001>
module attributes {stable_mosaic.version = 11 : i64} {
  func.func @_dma_copy_kernel(%arg0: memref<2x32xf32, #tpu.memory_space<any>>, %arg1: memref<2x32xf32, #tpu.memory_space<any>>, %arg2: memref<!tpu.dma_semaphore, #tpu.memory_space<semaphore_mem>>) attributes {dimension_semantics = [], scalar_prefetch = 0 : i64, scratch_operands = 1 : i64, tpu.core_type = #tpu.core_type<tc>} {
    tpu.enqueue_dma source(%arg0 : memref<2x32xf32, #tpu.memory_space<any>>) target(%arg1 : memref<2x32xf32, #tpu.memory_space<any>>) target_semaphore(%arg2 : memref<!tpu.dma_semaphore, #tpu.memory_space<semaphore_mem>>)
    tpu.wait_dma2 semaphore(%arg2 : memref<!tpu.dma_semaphore, #tpu.memory_space<semaphore_mem>>) src(%arg0 : memref<2x32xf32, #tpu.memory_space<any>>) dst(%arg1 : memref<2x32xf32, #tpu.memory_space<any>>)
    return
  }
}

</mosaic_0001>

<bundles_post_ra>
// kernel: tpu_custom_call.1
= control target key start
LH: loop header
LB: loop body
LE: loop exit
PB: predicated region body
PF: predicated region fallthrough
CT: control target
= control target key end

     0   :  { %s28_s6 = smov [#allocation2]   ;;  %s29_s7 = smov 131072   ;;  %s47_s0 = inlined_call_operand.hbm [shape: f32[2,32], index: 0, kind: input, shape index: {}]   ;;  %s48_s1 = inlined_call_operand.hbm [shape: f32[2,32], index: 1, kind: output, shape index: {}]  }
   0x1   :  { %s30_s8 = smov 0  }
   0x2   :  { %12 = dma.general %s47_s0, 32, %s48_s1, %s28_s6, %s29_s7, [#allocation4], %s30_s8, 0  }
   0x3   :  { %26 = dma.done.wait [#allocation2], 32 }
   0x4   :  { %27 = vsyncadd [#allocation2], 4294967264 }
   0x5   :  { %16 = vsyncmov [#allocation2] }
   0x8   :  { %s17_s13 = vpop.sfrf %16 }
   0x9   :  { %p22_p0 = scmp.ne.s32.totalorder %s17_s13, 0 }
   0xb   :  { %21 = shalt.err (%p22_p0)  }

</bundles_post_ra>
